<compile_context>
chip_gen: v7x
topology: tpu7x:2x2x1
jax: 0.10.0
libtpu: 0.0.40
codegen_flags: <defaults>
</compile_context>

<pallas_src>
from types import SimpleNamespace

import jax
import jax.numpy as jnp
from jax.experimental import pallas as pl
from jax.experimental.pallas import tpu as pltpu


# ---------------------------------------------------------------------------
# Kernel
# ---------------------------------------------------------------------------
def _vq_kernel(x_ref, w_in_ref, b_in_ref, cb_ref, cb_t_ref, cb_sq_ref,
               w_out_ref, b_out_ref, out_ref, idx_ref, sqerr_ref):
    # x_ref:     (TM, D)   token tile
    # w_in_ref:  (D, Dc)   project_in weight, b_in_ref: (1, Dc)
    # cb_ref:    (C, Dc)   codebook
    # cb_t_ref:  (Dc, C)   codebook transposed (precomputed, resident)
    # cb_sq_ref: (1, C)    per-code squared norms (precomputed, resident)
    # w_out_ref: (Dc, D)   project_out weight, b_out_ref: (1, D)
    x = x_ref[...].astype(jnp.float32)

    # project_in
    z = jnp.dot(x, w_in_ref[...], preferred_element_type=jnp.float32) + b_in_ref[...]

    # distances (up to a per-row constant): ||C||^2 - 2 z.C  -- same argmin as
    # the full euclidean distance; the -2 is folded into z (cheap (TM,Dc) op).
    zm2 = z * (-2.0)
    cross = jnp.dot(zm2, cb_t_ref[...], preferred_element_type=jnp.float32)  # (TM, C)
    dist = cross + cb_sq_ref[...]                                            # 1 VPU pass

    C = dist.shape[-1]
    iota = jax.lax.broadcasted_iota(jnp.int32, dist.shape, 1)                # (TM, C)
    dmin = jnp.min(dist, axis=-1, keepdims=True)                             # (TM, 1)
    # first index achieving the min (matches torch tie-break)
    idx = jnp.min(jnp.where(dist <= dmin, iota, C), axis=-1, keepdims=True)  # (TM, 1)

    # gather codebook rows via one-hot matmul (MXU-friendly gather)
    onehot = (iota == idx).astype(jnp.float32)                               # (TM, C)
    q = jnp.dot(onehot, cb_ref[...], preferred_element_type=jnp.float32)     # (TM, Dc)

    # per-row commitment-loss partials; global mean is formed in the wrapper
    diff = q - z
    sqerr_ref[...] = jnp.sum(diff * diff, axis=-1, keepdims=True)            # (TM, 1)

    # straight-through forward value == q ; project_out, store in caller dtype
    out = jnp.dot(q, w_out_ref[...], preferred_element_type=jnp.float32) + b_out_ref[...]
    out_ref[...] = out.astype(out_ref.dtype)
    idx_ref[...] = idx.astype(jnp.int32)


# ---------------------------------------------------------------------------
# Tiling helpers
# ---------------------------------------------------------------------------
_VMEM_BUDGET_BYTES = 24 * 1024 * 1024    # tile-selection budget (fits all gens)
_VMEM_LIMIT_BYTES = 48 * 1024 * 1024     # explicit scoped-VMEM limit (< v7x 64 MiB)


def _round_up(n, m):
    return ((n + m - 1) // m) * m


def _vmem_bytes_estimate(tm, d, dc, c):
    f32 = 4
    io_blocks = 2 * (tm * d) * 2                       # x in + out, double-buffered
    narrow = 2 * (tm * 2) * 2                          # idx + sqerr, double-buffered
    weights = 2 * (d * dc + dc + 2 * c * dc + c + dc * d + d)   # resident params
    temps = 4 * (tm * c) + 6 * (tm * dc)               # dist/iota/onehot/where, z/q/...
    return f32 * (io_blocks + narrow + weights + temps)


def _choose_tile_m(m, d, dc, c):
    tm = 512
    while tm > 8 and _vmem_bytes_estimate(tm, d, dc, c) > _VMEM_BUDGET_BYTES:
        tm //= 2
    return min(tm, _round_up(m, 8))


# ---------------------------------------------------------------------------
# Single-head forward
# ---------------------------------------------------------------------------
def vq_forward(x, params, commitment_weight=1.0):
    """Single VectorQuantize forward. x: (B, N, D), any float dtype."""
    B, N, D = x.shape
    M = B * N
    w_in, b_in, cb, cb_t, cb_sq, w_out, b_out = params
    C, Dc = cb.shape

    x2d = x.reshape(M, D)                       # no wrapper-side dtype cast
    tm = _choose_tile_m(M, D, Dc, C)
    m_pad = _round_up(M, tm)
    if m_pad != M:
        x2d = jnp.pad(x2d, ((0, m_pad - M), (0, 0)))
    grid = (m_pad // tm,)

    resident = lambda i: (0, 0)                 # weights stay put across the grid

    out2d, idx2d, sqerr = pl.pallas_call(
        _vq_kernel,
        grid=grid,
        in_specs=[
            pl.BlockSpec((tm, D), lambda i: (i, 0)),    # x tile
            pl.BlockSpec((D, Dc), resident),            # w_in
            pl.BlockSpec((1, Dc), resident),            # b_in
            pl.BlockSpec((C, Dc), resident),            # codebook
            pl.BlockSpec((Dc, C), resident),            # codebook^T
            pl.BlockSpec((1, C), resident),             # ||codebook||^2
            pl.BlockSpec((Dc, D), resident),            # w_out
            pl.BlockSpec((1, D), resident),             # b_out
        ],
        out_specs=(
            pl.BlockSpec((tm, D), lambda i: (i, 0)),    # projected output
            pl.BlockSpec((tm, 1), lambda i: (i, 0)),    # code indices
            pl.BlockSpec((tm, 1), lambda i: (i, 0)),    # per-row sq-error partials
        ),
        out_shape=(
            jax.ShapeDtypeStruct((m_pad, D), x.dtype),
            jax.ShapeDtypeStruct((m_pad, 1), jnp.int32),
            jax.ShapeDtypeStruct((m_pad, 1), jnp.float32),
        ),
        compiler_params=pltpu.CompilerParams(
            dimension_semantics=("parallel",),
            vmem_limit_bytes=_VMEM_LIMIT_BYTES,
        ),
    )(x2d, w_in, b_in, cb, cb_t, cb_sq, w_out, b_out)

    quantized = out2d[:M].reshape(B, N, D)
    indices = idx2d[:M, 0].reshape(B, N)
    # global mean over the (M, Dc) element grid (padded rows sliced away)
    loss = jnp.sum(sqerr[:M, 0]) / float(M * Dc) * commitment_weight
    return quantized, indices, loss


# ---------------------------------------------------------------------------
# Parameters / module wrapper
# ---------------------------------------------------------------------------
def init_vq_params(key, dim, codebook_dim, codebook_size):
    """Deterministic synthetic init for one VectorQuantize head."""
    k1, k2, k3, k4, k5 = jax.random.split(key, 5)
    w_in = jax.random.normal(k1, (dim, codebook_dim), jnp.float32) * (1.0 / jnp.sqrt(dim))
    b_in = jax.random.normal(k2, (1, codebook_dim), jnp.float32) * 0.01
    cb = jax.random.normal(k3, (codebook_size, codebook_dim), jnp.float32)
    cb_t = jnp.transpose(cb)                                    # (Dc, C), resident
    cb_sq = jnp.sum(cb * cb, axis=-1)[None, :]                  # (1, C), resident
    w_out = jax.random.normal(k4, (codebook_dim, dim), jnp.float32) * (1.0 / jnp.sqrt(codebook_dim))
    b_out = jax.random.normal(k5, (1, dim), jnp.float32) * 0.01
    return (w_in, b_in, cb, cb_t, cb_sq, w_out, b_out)


class VQS:
    """JAX/Pallas port of mushan.models.s0vq.with_tran.VQS (forward only)."""

    def __init__(self, config, key):
        self.vqs = {}
        in_dim = config.model.s0.in_dim
        # deterministic seeding: fold in the head index (no Python hash()).
        for i, para in enumerate(config.train.model_list):
            name = "_".join(str(p) for p in para)
            sub = jax.random.fold_in(key, i)
            self.vqs[name] = init_vq_params(sub, in_dim, para[0], para[1])

        # all heads run inside one jit so XLA can overlap their pallas_calls
        self._forward_all = jax.jit(
            lambda x, params: {k: vq_forward(x, p) for k, p in params.items()})
        self._forward_one = jax.jit(lambda x, params: vq_forward(x, params))

    def forward(self, x, key=None):
        if key is None:
            return self._forward_all(x, self.vqs)
        return self._forward_one(x, self.vqs[key])

    def infer(self, x, key=None):
        q, c, _ = self._forward_one(x, self.vqs[key])
        return q, c

    def keys(self):
        return self.vqs.keys()


# ---------------------------------------------------------------------------
# Demo / smoke test
# ---------------------------------------------------------------------------
if __name__ == "__main__":
    # small synthetic config: two VQ heads, in_dim=32
    config = SimpleNamespace(
        train=SimpleNamespace(model_list=[[16, 128], [32, 256]]),
        model=SimpleNamespace(s0=SimpleNamespace(in_dim=32)),
    )

    root = jax.random.PRNGKey(0)
    k_params, k_x = jax.random.split(root)

    model = VQS(config, k_params)

    B, N, D = 2, 8, config.model.s0.in_dim
    x = jax.random.normal(k_x, (B, N, D), jnp.float32)

    # forward over all VQs (dict return, like the PyTorch module)
    res = model.forward(x)
    for name, (q, idx, loss) in res.items():
        jax.block_until_ready(q)
        jax.block_until_ready(idx)
        jax.block_until_ready(loss)
        assert q.shape == (B, N, D)
        assert idx.shape == (B, N)
        assert loss.shape == ()

    # keyed forward / infer paths
    q, c = model.infer(x, key="16_128")
    jax.block_until_ready(q)
    jax.block_until_ready(c)

    print("KERNEL_OK")
</pallas_src>

<mosaic_0001>
module attributes {stable_mosaic.version = 11 : i64} {
  func.func @_vq_kernel(%arg0: i32, %arg1: memref<16x32xf32, #tpu.memory_space<vmem>>, %arg2: memref<32x32xf32, #tpu.memory_space<vmem>>, %arg3: memref<1x32xf32, #tpu.memory_space<vmem>>, %arg4: memref<256x32xf32, #tpu.memory_space<vmem>>, %arg5: memref<32x256xf32, #tpu.memory_space<vmem>>, %arg6: memref<1x256xf32, #tpu.memory_space<vmem>>, %arg7: memref<32x32xf32, #tpu.memory_space<vmem>>, %arg8: memref<1x32xf32, #tpu.memory_space<vmem>>, %arg9: memref<16x32xf32, #tpu.memory_space<vmem>>, %arg10: memref<16x1xi32, #tpu.memory_space<vmem>>, %arg11: memref<16x1xf32, #tpu.memory_space<vmem>>) attributes {dimension_semantics = [#tpu.dimension_semantics<parallel>], iteration_bounds = array<i64: 1>, scalar_prefetch = 0 : i64, scratch_operands = 0 : i64, tpu.core_type = #tpu.core_type<tc>, window_params = [{transform_indices = @transform_0, window_bounds = array<i64: 16, 32>}, {pipeline_mode = #tpu.pipeline_mode<synchronous>, transform_indices = @transform_1, window_bounds = array<i64: 32, 32>}, {pipeline_mode = #tpu.pipeline_mode<synchronous>, transform_indices = @transform_2, window_bounds = array<i64: 1, 32>}, {pipeline_mode = #tpu.pipeline_mode<synchronous>, transform_indices = @transform_3, window_bounds = array<i64: 256, 32>}, {pipeline_mode = #tpu.pipeline_mode<synchronous>, transform_indices = @transform_4, window_bounds = array<i64: 32, 256>}, {pipeline_mode = #tpu.pipeline_mode<synchronous>, transform_indices = @transform_5, window_bounds = array<i64: 1, 256>}, {pipeline_mode = #tpu.pipeline_mode<synchronous>, transform_indices = @transform_6, window_bounds = array<i64: 32, 32>}, {pipeline_mode = #tpu.pipeline_mode<synchronous>, transform_indices = @transform_7, window_bounds = array<i64: 1, 32>}, {transform_indices = @transform_8, window_bounds = array<i64: 16, 32>}, {transform_indices = @transform_9, window_bounds = array<i64: 16, 1>}, {transform_indices = @transform_10, window_bounds = array<i64: 16, 1>}]} {
    %c0 = arith.constant 0 : index
    %c0_0 = arith.constant 0 : index
    %0 = vector.load %arg1[%c0, %c0_0] : memref<16x32xf32, #tpu.memory_space<vmem>>, vector<16x32xf32>
    %c0_1 = arith.constant 0 : index
    %c0_2 = arith.constant 0 : index
    %1 = vector.load %arg2[%c0_1, %c0_2] : memref<32x32xf32, #tpu.memory_space<vmem>>, vector<32x32xf32>
    %cst = arith.constant dense<0.000000e+00> : vector<16x32xf32>
    %2 = tpu.matmul %0, %1, %cst {dimension_numbers = #tpu.dot_dimension_numbers<[1], [0], [0], [1], [0, 0, 1, 1], [], []>} : vector<16x32xf32>, vector<32x32xf32>, vector<16x32xf32> -> vector<16x32xf32>
    %c0_3 = arith.constant 0 : index
    %c0_4 = arith.constant 0 : index
    %3 = vector.load %arg3[%c0_3, %c0_4] : memref<1x32xf32, #tpu.memory_space<vmem>>, vector<1x32xf32>
    %4 = vector.broadcast %3 : vector<1x32xf32> to vector<16x32xf32>
    %5 = arith.addf %2, %4 : vector<16x32xf32>
    %cst_5 = arith.constant -2.000000e+00 : f32
    %6 = vector.broadcast %cst_5 : f32 to vector<16x32xf32>
    %7 = arith.mulf %5, %6 : vector<16x32xf32>
    %c0_6 = arith.constant 0 : index
    %c0_7 = arith.constant 0 : index
    %8 = vector.load %arg5[%c0_6, %c0_7] : memref<32x256xf32, #tpu.memory_space<vmem>>, vector<32x256xf32>
    %cst_8 = arith.constant dense<0.000000e+00> : vector<16x256xf32>
    %9 = tpu.matmul %7, %8, %cst_8 {dimension_numbers = #tpu.dot_dimension_numbers<[1], [0], [0], [1], [0, 0, 1, 1], [], []>} : vector<16x32xf32>, vector<32x256xf32>, vector<16x256xf32> -> vector<16x256xf32>
    %c0_9 = arith.constant 0 : index
    %c0_10 = arith.constant 0 : index
    %10 = vector.load %arg6[%c0_9, %c0_10] : memref<1x256xf32, #tpu.memory_space<vmem>>, vector<1x256xf32>
    %11 = vector.broadcast %10 : vector<1x256xf32> to vector<16x256xf32>
    %12 = arith.addf %9, %11 : vector<16x256xf32>
    %13 = tpu.iota {dimensions = array<i32: 1>} : vector<16x256xi32>
    %cst_11 = arith.constant dense<0x7F800000> : vector<16xf32>
    %14 = vector.multi_reduction <minimumf>, %12, %cst_11 [1] : vector<16x256xf32> to vector<16xf32>
    %15 = vector.shape_cast %14 : vector<16xf32> to vector<16x1xf32>
    %16 = vector.broadcast %15 : vector<16x1xf32> to vector<16x256xf32>
    %17 = arith.cmpf ole, %12, %16 : vector<16x256xf32>
    %c256_i32 = arith.constant 256 : i32
    %18 = vector.broadcast %c256_i32 : i32 to vector<16x256xi32>
    %19 = arith.select %17, %13, %18 : vector<16x256xi1>, vector<16x256xi32>
    %cst_12 = arith.constant dense<2147483647> : vector<16xi32>
    %20 = vector.multi_reduction <minsi>, %19, %cst_12 [1] : vector<16x256xi32> to vector<16xi32>
    %21 = vector.shape_cast %20 : vector<16xi32> to vector<16x1xi32>
    %22 = vector.broadcast %21 : vector<16x1xi32> to vector<16x256xi32>
    %23 = arith.cmpi eq, %13, %22 : vector<16x256xi32>
    %24 = arith.extui %23 : vector<16x256xi1> to vector<16x256xi32>
    %25 = arith.sitofp %24 : vector<16x256xi32> to vector<16x256xf32>
    %c0_13 = arith.constant 0 : index
    %c0_14 = arith.constant 0 : index
    %26 = vector.load %arg4[%c0_13, %c0_14] : memref<256x32xf32, #tpu.memory_space<vmem>>, vector<256x32xf32>
    %cst_15 = arith.constant dense<0.000000e+00> : vector<16x32xf32>
    %27 = tpu.matmul %25, %26, %cst_15 {dimension_numbers = #tpu.dot_dimension_numbers<[1], [0], [0], [1], [0, 0, 1, 1], [], []>} : vector<16x256xf32>, vector<256x32xf32>, vector<16x32xf32> -> vector<16x32xf32>
    %28 = arith.subf %27, %5 : vector<16x32xf32>
    %29 = arith.mulf %28, %28 : vector<16x32xf32>
    %cst_16 = arith.constant dense<0.000000e+00> : vector<16xf32>
    %30 = vector.multi_reduction <add>, %29, %cst_16 [1] : vector<16x32xf32> to vector<16xf32>
    %31 = vector.shape_cast %30 : vector<16xf32> to vector<16x1xf32>
    %c0_17 = arith.constant 0 : index
    %c0_18 = arith.constant 0 : index
    %32 = vector.load %arg11[%c0_17, %c0_18] : memref<16x1xf32, #tpu.memory_space<vmem>>, vector<16x1xf32>
    tpu.vector_store %arg11[%c0_17, %c0_18], %31 {strides = array<i32>} : memref<16x1xf32, #tpu.memory_space<vmem>>, vector<16x1xf32>,
    %c0_19 = arith.constant 0 : index
    %c0_20 = arith.constant 0 : index
    %33 = vector.load %arg7[%c0_19, %c0_20] : memref<32x32xf32, #tpu.memory_space<vmem>>, vector<32x32xf32>
    %cst_21 = arith.constant dense<0.000000e+00> : vector<16x32xf32>
    %34 = tpu.matmul %27, %33, %cst_21 {dimension_numbers = #tpu.dot_dimension_numbers<[1], [0], [0], [1], [0, 0, 1, 1], [], []>} : vector<16x32xf32>, vector<32x32xf32>, vector<16x32xf32> -> vector<16x32xf32>
    %c0_22 = arith.constant 0 : index
    %c0_23 = arith.constant 0 : index
    %35 = vector.load %arg8[%c0_22, %c0_23] : memref<1x32xf32, #tpu.memory_space<vmem>>, vector<1x32xf32>
    %36 = vector.broadcast %35 : vector<1x32xf32> to vector<16x32xf32>
    %37 = arith.addf %34, %36 : vector<16x32xf32>
    %c0_24 = arith.constant 0 : index
    %c0_25 = arith.constant 0 : index
    %38 = vector.load %arg9[%c0_24, %c0_25] : memref<16x32xf32, #tpu.memory_space<vmem>>, vector<16x32xf32>
    tpu.vector_store %arg9[%c0_24, %c0_25], %37 {strides = array<i32>} : memref<16x32xf32, #tpu.memory_space<vmem>>, vector<16x32xf32>,
    %c0_26 = arith.constant 0 : index
    %c0_27 = arith.constant 0 : index
    %39 = vector.load %arg10[%c0_26, %c0_27] : memref<16x1xi32, #tpu.memory_space<vmem>>, vector<16x1xi32>
    tpu.vector_store %arg10[%c0_26, %c0_27], %21 {strides = array<i32>} : memref<16x1xi32, #tpu.memory_space<vmem>>, vector<16x1xi32>,
    return
  }
  func.func @transform_0(%arg0: i32) -> (i32, i32) {
    %c0_i32 = arith.constant 0 : i32
    %c0_i32_0 = arith.constant 0 : i32
    return %arg0, %c0_i32 : i32, i32
  }
  func.func @transform_1(%arg0: i32) -> (i32, i32) {
    %c0_i32 = arith.constant 0 : i32
    %c0_i32_0 = arith.constant 0 : i32
    %c0_i32_1 = arith.constant 0 : i32
    return %c0_i32, %c0_i32_0 : i32, i32
  }
  func.func @transform_2(%arg0: i32) -> (i32, i32) {
    %c0_i32 = arith.constant 0 : i32
    %c0_i32_0 = arith.constant 0 : i32
    %c0_i32_1 = arith.constant 0 : i32
    return %c0_i32, %c0_i32_0 : i32, i32
  }
  func.func @transform_3(%arg0: i32) -> (i32, i32) {
    %c0_i32 = arith.constant 0 : i32
    %c0_i32_0 = arith.constant 0 : i32
    %c0_i32_1 = arith.constant 0 : i32
    return %c0_i32, %c0_i32_0 : i32, i32
  }
  func.func @transform_4(%arg0: i32) -> (i32, i32) {
    %c0_i32 = arith.constant 0 : i32
    %c0_i32_0 = arith.constant 0 : i32
    %c0_i32_1 = arith.constant 0 : i32
    return %c0_i32, %c0_i32_0 : i32, i32
  }
  func.func @transform_5(%arg0: i32) -> (i32, i32) {
    %c0_i32 = arith.constant 0 : i32
    %c0_i32_0 = arith.constant 0 : i32
    %c0_i32_1 = arith.constant 0 : i32
    return %c0_i32, %c0_i32_0 : i32, i32
  }
  func.func @transform_6(%arg0: i32) -> (i32, i32) {
    %c0_i32 = arith.constant 0 : i32
    %c0_i32_0 = arith.constant 0 : i32
    %c0_i32_1 = arith.constant 0 : i32
    return %c0_i32, %c0_i32_0 : i32, i32
  }
  func.func @transform_7(%arg0: i32) -> (i32, i32) {
    %c0_i32 = arith.constant 0 : i32
    %c0_i32_0 = arith.constant 0 : i32
    %c0_i32_1 = arith.constant 0 : i32
    return %c0_i32, %c0_i32_0 : i32, i32
  }
  func.func @transform_8(%arg0: i32) -> (i32, i32) {
    %c0_i32 = arith.constant 0 : i32
    %c0_i32_0 = arith.constant 0 : i32
    return %arg0, %c0_i32 : i32, i32
  }
  func.func @transform_9(%arg0: i32) -> (i32, i32) {
    %c0_i32 = arith.constant 0 : i32
    %c0_i32_0 = arith.constant 0 : i32
    return %arg0, %c0_i32 : i32, i32
  }
  func.func @transform_10(%arg0: i32) -> (i32, i32) {
    %c0_i32 = arith.constant 0 : i32
    %c0_i32_0 = arith.constant 0 : i32
    return %arg0, %c0_i32 : i32, i32
  }
}

module attributes {stable_mosaic.version = 11 : i64} {
  func.func @_vq_kernel(%arg0: i32, %arg1: memref<16x32xf32, #tpu.memory_space<vmem>>, %arg2: memref<32x16xf32, #tpu.memory_space<vmem>>, %arg3: memref<1x16xf32, #tpu.memory_space<vmem>>, %arg4: memref<128x16xf32, #tpu.memory_space<vmem>>, %arg5: memref<16x128xf32, #tpu.memory_space<vmem>>, %arg6: memref<1x128xf32, #tpu.memory_space<vmem>>, %arg7: memref<16x32xf32, #tpu.memory_space<vmem>>, %arg8: memref<1x32xf32, #tpu.memory_space<vmem>>, %arg9: memref<16x32xf32, #tpu.memory_space<vmem>>, %arg10: memref<16x1xi32, #tpu.memory_space<vmem>>, %arg11: memref<16x1xf32, #tpu.memory_space<vmem>>) attributes {dimension_semantics = [#tpu.dimension_semantics<parallel>], iteration_bounds = array<i64: 1>, scalar_prefetch = 0 : i64, scratch_operands = 0 : i64, tpu.core_type = #tpu.core_type<tc>, window_params = [{transform_indices = @transform_0, window_bounds = array<i64: 16, 32>}, {pipeline_mode = #tpu.pipeline_mode<synchronous>, transform_indices = @transform_1, window_bounds = array<i64: 32, 16>}, {pipeline_mode = #tpu.pipeline_mode<synchronous>, transform_indices = @transform_2, window_bounds = array<i64: 1, 16>}, {pipeline_mode = #tpu.pipeline_mode<synchronous>, transform_indices = @transform_3, window_bounds = array<i64: 128, 16>}, {pipeline_mode = #tpu.pipeline_mode<synchronous>, transform_indices = @transform_4, window_bounds = array<i64: 16, 128>}, {pipeline_mode = #tpu.pipeline_mode<synchronous>, transform_indices = @transform_5, window_bounds = array<i64: 1, 128>}, {pipeline_mode = #tpu.pipeline_mode<synchronous>, transform_indices = @transform_6, window_bounds = array<i64: 16, 32>}, {pipeline_mode = #tpu.pipeline_mode<synchronous>, transform_indices = @transform_7, window_bounds = array<i64: 1, 32>}, {transform_indices = @transform_8, window_bounds = array<i64: 16, 32>}, {transform_indices = @transform_9, window_bounds = array<i64: 16, 1>}, {transform_indices = @transform_10, window_bounds = array<i64: 16, 1>}]} {
    %c0 = arith.constant 0 : index
    %c0_0 = arith.constant 0 : index
    %0 = vector.load %arg1[%c0, %c0_0] : memref<16x32xf32, #tpu.memory_space<vmem>>, vector<16x32xf32>
    %c0_1 = arith.constant 0 : index
    %c0_2 = arith.constant 0 : index
    %1 = vector.load %arg2[%c0_1, %c0_2] : memref<32x16xf32, #tpu.memory_space<vmem>>, vector<32x16xf32>
    %cst = arith.constant dense<0.000000e+00> : vector<16x16xf32>
    %2 = tpu.matmul %0, %1, %cst {dimension_numbers = #tpu.dot_dimension_numbers<[1], [0], [0], [1], [0, 0, 1, 1], [], []>} : vector<16x32xf32>, vector<32x16xf32>, vector<16x16xf32> -> vector<16x16xf32>
    %c0_3 = arith.constant 0 : index
    %c0_4 = arith.constant 0 : index
    %3 = vector.load %arg3[%c0_3, %c0_4] : memref<1x16xf32, #tpu.memory_space<vmem>>, vector<1x16xf32>
    %4 = vector.broadcast %3 : vector<1x16xf32> to vector<16x16xf32>
    %5 = arith.addf %2, %4 : vector<16x16xf32>
    %cst_5 = arith.constant -2.000000e+00 : f32
    %6 = vector.broadcast %cst_5 : f32 to vector<16x16xf32>
    %7 = arith.mulf %5, %6 : vector<16x16xf32>
    %c0_6 = arith.constant 0 : index
    %c0_7 = arith.constant 0 : index
    %8 = vector.load %arg5[%c0_6, %c0_7] : memref<16x128xf32, #tpu.memory_space<vmem>>, vector<16x128xf32>
    %cst_8 = arith.constant dense<0.000000e+00> : vector<16x128xf32>
    %9 = tpu.matmul %7, %8, %cst_8 {dimension_numbers = #tpu.dot_dimension_numbers<[1], [0], [0], [1], [0, 0, 1, 1], [], []>} : vector<16x16xf32>, vector<16x128xf32>, vector<16x128xf32> -> vector<16x128xf32>
    %c0_9 = arith.constant 0 : index
    %c0_10 = arith.constant 0 : index
    %10 = vector.load %arg6[%c0_9, %c0_10] : memref<1x128xf32, #tpu.memory_space<vmem>>, vector<1x128xf32>
    %11 = vector.broadcast %10 : vector<1x128xf32> to vector<16x128xf32>
    %12 = arith.addf %9, %11 : vector<16x128xf32>
    %13 = tpu.iota {dimensions = array<i32: 1>} : vector<16x128xi32>
    %cst_11 = arith.constant dense<0x7F800000> : vector<16xf32>
    %14 = vector.multi_reduction <minimumf>, %12, %cst_11 [1] : vector<16x128xf32> to vector<16xf32>
    %15 = vector.shape_cast %14 : vector<16xf32> to vector<16x1xf32>
    %16 = vector.broadcast %15 : vector<16x1xf32> to vector<16x128xf32>
    %17 = arith.cmpf ole, %12, %16 : vector<16x128xf32>
    %c128_i32 = arith.constant 128 : i32
    %18 = vector.broadcast %c128_i32 : i32 to vector<16x128xi32>
    %19 = arith.select %17, %13, %18 : vector<16x128xi1>, vector<16x128xi32>
    %cst_12 = arith.constant dense<2147483647> : vector<16xi32>
    %20 = vector.multi_reduction <minsi>, %19, %cst_12 [1] : vector<16x128xi32> to vector<16xi32>
    %21 = vector.shape_cast %20 : vector<16xi32> to vector<16x1xi32>
    %22 = vector.broadcast %21 : vector<16x1xi32> to vector<16x128xi32>
    %23 = arith.cmpi eq, %13, %22 : vector<16x128xi32>
    %24 = arith.extui %23 : vector<16x128xi1> to vector<16x128xi32>
    %25 = arith.sitofp %24 : vector<16x128xi32> to vector<16x128xf32>
    %c0_13 = arith.constant 0 : index
    %c0_14 = arith.constant 0 : index
    %26 = vector.load %arg4[%c0_13, %c0_14] : memref<128x16xf32, #tpu.memory_space<vmem>>, vector<128x16xf32>
    %cst_15 = arith.constant dense<0.000000e+00> : vector<16x16xf32>
    %27 = tpu.matmul %25, %26, %cst_15 {dimension_numbers = #tpu.dot_dimension_numbers<[1], [0], [0], [1], [0, 0, 1, 1], [], []>} : vector<16x128xf32>, vector<128x16xf32>, vector<16x16xf32> -> vector<16x16xf32>
    %28 = arith.subf %27, %5 : vector<16x16xf32>
    %29 = arith.mulf %28, %28 : vector<16x16xf32>
    %cst_16 = arith.constant dense<0.000000e+00> : vector<16xf32>
    %30 = vector.multi_reduction <add>, %29, %cst_16 [1] : vector<16x16xf32> to vector<16xf32>
    %31 = vector.shape_cast %30 : vector<16xf32> to vector<16x1xf32>
    %c0_17 = arith.constant 0 : index
    %c0_18 = arith.constant 0 : index
    %32 = vector.load %arg11[%c0_17, %c0_18] : memref<16x1xf32, #tpu.memory_space<vmem>>, vector<16x1xf32>
    tpu.vector_store %arg11[%c0_17, %c0_18], %31 {strides = array<i32>} : memref<16x1xf32, #tpu.memory_space<vmem>>, vector<16x1xf32>,
    %c0_19 = arith.constant 0 : index
    %c0_20 = arith.constant 0 : index
    %33 = vector.load %arg7[%c0_19, %c0_20] : memref<16x32xf32, #tpu.memory_space<vmem>>, vector<16x32xf32>
    %cst_21 = arith.constant dense<0.000000e+00> : vector<16x32xf32>
    %34 = tpu.matmul %27, %33, %cst_21 {dimension_numbers = #tpu.dot_dimension_numbers<[1], [0], [0], [1], [0, 0, 1, 1], [], []>} : vector<16x16xf32>, vector<16x32xf32>, vector<16x32xf32> -> vector<16x32xf32>
    %c0_22 = arith.constant 0 : index
    %c0_23 = arith.constant 0 : index
    %35 = vector.load %arg8[%c0_22, %c0_23] : memref<1x32xf32, #tpu.memory_space<vmem>>, vector<1x32xf32>
    %36 = vector.broadcast %35 : vector<1x32xf32> to vector<16x32xf32>
    %37 = arith.addf %34, %36 : vector<16x32xf32>
    %c0_24 = arith.constant 0 : index
    %c0_25 = arith.constant 0 : index
    %38 = vector.load %arg9[%c0_24, %c0_25] : memref<16x32xf32, #tpu.memory_space<vmem>>, vector<16x32xf32>
    tpu.vector_store %arg9[%c0_24, %c0_25], %37 {strides = array<i32>} : memref<16x32xf32, #tpu.memory_space<vmem>>, vector<16x32xf32>,
    %c0_26 = arith.constant 0 : index
    %c0_27 = arith.constant 0 : index
    %39 = vector.load %arg10[%c0_26, %c0_27] : memref<16x1xi32, #tpu.memory_space<vmem>>, vector<16x1xi32>
    tpu.vector_store %arg10[%c0_26, %c0_27], %21 {strides = array<i32>} : memref<16x1xi32, #tpu.memory_space<vmem>>, vector<16x1xi32>,
    return
  }
  func.func @transform_0(%arg0: i32) -> (i32, i32) {
    %c0_i32 = arith.constant 0 : i32
    %c0_i32_0 = arith.constant 0 : i32
    return %arg0, %c0_i32 : i32, i32
  }
  func.func @transform_1(%arg0: i32) -> (i32, i32) {
    %c0_i32 = arith.constant 0 : i32
    %c0_i32_0 = arith.constant 0 : i32
    %c0_i32_1 = arith.constant 0 : i32
    return %c0_i32, %c0_i32_0 : i32, i32
  }
  func.func @transform_2(%arg0: i32) -> (i32, i32) {
    %c0_i32 = arith.constant 0 : i32
    %c0_i32_0 = arith.constant 0 : i32
    %c0_i32_1 = arith.constant 0 : i32
    return %c0_i32, %c0_i32_0 : i32, i32
  }
  func.func @transform_3(%arg0: i32) -> (i32, i32) {
    %c0_i32 = arith.constant 0 : i32
    %c0_i32_0 = arith.constant 0 : i32
    %c0_i32_1 = arith.constant 0 : i32
    return %c0_i32, %c0_i32_0 : i32, i32
  }
  func.func @transform_4(%arg0: i32) -> (i32, i32) {
    %c0_i32 = arith.constant 0 : i32
    %c0_i32_0 = arith.constant 0 : i32
    %c0_i32_1 = arith.constant 0 : i32
    return %c0_i32, %c0_i32_0 : i32, i32
  }
  func.func @transform_5(%arg0: i32) -> (i32, i32) {
    %c0_i32 = arith.constant 0 : i32
    %c0_i32_0 = arith.constant 0 : i32
    %c0_i32_1 = arith.constant 0 : i32
    return %c0_i32, %c0_i32_0 : i32, i32
  }
  func.func @transform_6(%arg0: i32) -> (i32, i32) {
    %c0_i32 = arith.constant 0 : i32
    %c0_i32_0 = arith.constant 0 : i32
    %c0_i32_1 = arith.constant 0 : i32
    return %c0_i32, %c0_i32_0 : i32, i32
  }
  func.func @transform_7(%arg0: i32) -> (i32, i32) {
    %c0_i32 = arith.constant 0 : i32
    %c0_i32_0 = arith.constant 0 : i32
    %c0_i32_1 = arith.constant 0 : i32
    return %c0_i32, %c0_i32_0 : i32, i32
  }
  func.func @transform_8(%arg0: i32) -> (i32, i32) {
    %c0_i32 = arith.constant 0 : i32
    %c0_i32_0 = arith.constant 0 : i32
    return %arg0, %c0_i32 : i32, i32
  }
  func.func @transform_9(%arg0: i32) -> (i32, i32) {
    %c0_i32 = arith.constant 0 : i32
    %c0_i32_0 = arith.constant 0 : i32
    return %arg0, %c0_i32 : i32, i32
  }
  func.func @transform_10(%arg0: i32) -> (i32, i32) {
    %c0_i32 = arith.constant 0 : i32
    %c0_i32_0 = arith.constant 0 : i32
    return %arg0, %c0_i32 : i32, i32
  }
}

</mosaic_0001>

<bundles_post_ra>
// kernel: squeeze.6
= control target key start
LH: loop header
LB: loop body
LE: loop exit
PB: predicated region body
PF: predicated region fallthrough
CT: control target
= control target key end

     0   :  { %s85_s0 = inlined_call_operand.vmem [shape: s32[16], index: 0, kind: input, shape index: {}]   ;;  %s86_s1 = inlined_call_operand.hbm [shape: s32[2,8], index: 1, kind: output, shape index: {}]  }
   0x1   :  { %v5_v0 = vld [vmem:[%s85_s0] sm:$0x1] }
   0x2   :  { %2 = vsyncpa [#allocation1], 0  ;;  %6 = vst [vmem:[#allocation3] sm:$0x1] %v5_v0  ;;  %vm8_vm0 = vcmask 64512   ;;  %s58_s0 = smov 120  }
   0x3   :  { %s59_s8 = smov [#allocation0]  }
   0x4   :  { %s26_s9 = sshll.u32 %s59_s8, 4  ;;  %s27_s9 = int_to_ptr.vmem [resolvable:$true] %s26_s9 }
   0x5   :  { %s34_s10 = scalar_lea.vmem %s27_s9, 32  ;;  %p39_p1 = scmp.lt.s32.totalorder %s27_s9, %s27_s9 }
   0x6   :  { %p35_p0 = scmp.ne.s32.totalorder %s27_s9, %s34_s10  ;;  %p40_p2 = scmp.lt.s32.totalorder %s34_s10, %s34_s10 }
   0x8   :  { %p41_p3 = por %p40_p2, %p39_p1 }
   0x9   :  { %v10_v1 = vld [vmem:[#allocation3] sm:$0x1]  }
   0xa   :  { %v7_v2 = vld [vmem:[#allocation3] sm:$0x1]   ;;  %11 = vrot.lane.b32.xlu0 %v10_v1, %s58_s0  ;;  %p42_p4 = pnand %p41_p3, %p35_p0 }
   0xb   :  { %9 = vst.msk [vmem:[#allocation2] sm:$0x1] %vm8_vm0, %v7_v2  }
  0x7c   :  { %v12_v3 = vpop.permute.xlu0 %11  }
  0x7d   :  { %15 = vst.msk [vmem:[#allocation2 + $0x1] sm:$0x1] %vm8_vm0, %v12_v3  }
  0x84   :  { %v19_v4 = vld [vmem:[#allocation2] sm:$0x3] }
  0x85   :  { %21 = vst [vmem:[#allocation0] sm:$0x3] %v19_v4 }
  0x86   :  { %45 = shalt.err (!%p42_p4)
}
  0x87   :  { %s46_s13 = scalar_lea.hbm %s86_s1, 32 }
  0x88   :  { %p47_p5 = scmp.ne.s32.totalorder %s86_s1, %s46_s13  ;;  %p50_p6 = scmp.lt.u32.totalorder %s46_s13, %s86_s1 }
  0x8a   :  { %p52_p7 = pnand %p50_p6, %p47_p5 }
  0x8c   :  { %55 = shalt.err (!%p52_p7)
}
  0x8d   :  { %29 = dma.vmem_to_hbm [thread:$0]  %s27_s9, 32, %s86_s1, [#allocation1]  }
  0x8e   :  { %56 = dma.done.wait [#allocation1], 32  }
  0x8f   :  { %57 = vsyncadd [#allocation1], 4294967264 }
  0x90   :  { %31 = vsyncpa [#allocation1], 1 }

// kernel: _lambda_.2
= control target key start
LH: loop header
LB: loop body
LE: loop exit
PB: predicated region body
PF: predicated region fallthrough
CT: control target
= control target key end

     0   :  { %vm46_vm0 = vcmask 261120   ;;  %s866_s0 = inlined_call_operand.vmem [shape: f32[16,32], index: 0, kind: input, shape index: {}]   ;;  %s867_s1 = inlined_call_operand.vmem [shape: f32[32,16], index: 1, kind: input, shape index: {}]   ;;  %s868_s2 = inlined_call_operand.vmem [shape: f32[1,16], index: 2, kind: input, shape index: {}]   ;;  %s869_s3 = inlined_call_operand.vmem [shape: f32[128,16], index: 3, kind: input, shape index: {}]   ;;  %s870_s4 = inlined_call_operand.vmem [shape: f32[16,128], index: 4, kind: input, shape index: {}]   ;;  %s871_s5 = inlined_call_operand.vmem [shape: f32[1,128], index: 5, kind: input, shape index: {}]   ;;  %s872_s6 = inlined_call_operand.vmem [shape: f32[16,32], index: 6, kind: input, shape index: {}]   ;;  %s873_s7 = inlined_call_operand.vmem [shape: f32[1,32], index: 7, kind: input, shape index: {}]   ;;  %s874_s8 = inlined_call_operand.hbm [shape: f32[16,32], index: 8, kind: output, shape index: {0}]   ;;  %s875_s9 = inlined_call_operand.vmem [shape: s32[16,1], index: 9, kind: output, shape index: {1}]   ;;  %s876_s10 = inlined_call_operand.vmem [shape: f32[16,1], index: 10, kind: output, shape index: {2}]  }
   0x1   :  { %v35_v0 = vld [vmem:[%s867_s1] sm:$0xff]  ;;  %v36_v1 = vld [vmem:[%s867_s1 + $0x8] sm:$0xff]  ;;  %v37_v2 = vld [vmem:[%s867_s1 + $0x10] sm:$0xff] }
   0x2   :  { %v592_v3 = vpack.c.bf16 %v36_v1, %v35_v0  ;;  %v38_v4 = vld [vmem:[%s867_s1 + $0x18] sm:$0xff]  ;;  %v33_v5 = vld [vmem:[%s866_s0] sm:$0xff] }
   0x3   :  { %v596_v6 = vpack.c.bf16 %v38_v4, %v37_v2  ;;  %540 = vmatprep.mubr.msk.f32.mxu0 %vm46_vm0, %v33_v5 }
   0x4   :  { %16 = vsyncpa [#allocation3], 0  ;;  %593 = vmatprep.subr.bf16.mxu0 %v592_v3  ;;  %v34_v7 = vld [vmem:[%s866_s0 + $0x8] sm:$0xff]  ;;  %v130_v8 = vld [vmem:[%s870_s4] sm:$0xff]  ;;  %vm139_vm1 = vcmask 130048   ;;  %v221_v23 = vlaneseq  ;;  %vm366_vm6 = vcmask 7168  }
   0x5   :  { %595 = vmatpush3.bf16.msra.mxu0 %v592_v3  ;;  %v131_v9 = vld [vmem:[%s870_s4 + $0x8] sm:$0xff]  ;;  %v487_v11 = vld [vmem:[%s868_s2] ss:$0 sm:$0xff]  ;;  %v267_v35 = vld [vmem:[%s869_s3 + $0x10] sm:$0xff]  ;;  %s669_s1 = smov [#allocation2]  }
   0x6   :  { %597 = vmatprep.subr.bf16.mxu0 %v596_v6  ;;  %v600_v10 = vpack.c.bf16 %v131_v9, %v130_v8  ;;  %v490_v18 = vld [vmem:[%s871_s5] ss:$0 sm:$0xff]  ;;  %v767_v24 = vand.u32 127, %v221_v23  ;;  %v266_v34 = vld [vmem:[%s869_s3 + $0x8] sm:$0xff]  ;;  %v268_v37 = vld [vmem:[%s869_s3 + $0x18] sm:$0xff]  ;;  %s468_s26 = sshll.u32 %s669_s1, 4  ;;  %s469_s26 = int_to_ptr.vmem [resolvable:$true] %s468_s26 }
   0x7   :  { %v265_v33 = vld [vmem:[%s869_s3] sm:$0xff]  ;;  %v608_v38 = vpack.c.bf16 %v268_v37, %v267_v35  ;;  %v270_v40 = vld [vmem:[%s869_s3 + $0x28] sm:$0xff]  ;;  %v271_v42 = vld [vmem:[%s869_s3 + $0x30] sm:$0xff]  ;;  %s644_s27 = scalar_lea.vmem %s469_s26, 256  ;;  %p649_p1 = scmp.lt.s32.totalorder %s469_s26, %s469_s26 }
   0x8   :  { %v604_v36 = vpack.c.bf16 %v266_v34, %v265_v33  ;;  %v269_v39 = vld [vmem:[%s869_s3 + $0x20] sm:$0xff]  ;;  %v272_v43 = vld [vmem:[%s869_s3 + $0x38] sm:$0xff]  ;;  %v274_v46 = vld [vmem:[%s869_s3 + $0x48] sm:$0xff]  ;;  %p645_p0 = scmp.ne.s32.totalorder %s469_s26, %s644_s27  ;;  %p650_p2 = scmp.lt.s32.totalorder %s644_s27, %s644_s27 }
   0x9   :  { %599 = vmatpush3.bf16.msra.mxu0 %v596_v6  ;;  %v612_v41 = vpack.c.bf16 %v270_v40, %v269_v39  ;;  %v616_v44 = vpack.c.bf16 %v272_v43, %v271_v42  ;;  %v273_v45 = vld [vmem:[%s869_s3 + $0x40] sm:$0xff]  ;;  %v275_v48 = vld [vmem:[%s869_s3 + $0x50] sm:$0xff]  ;;  %v276_v49 = vld [vmem:[%s869_s3 + $0x58] sm:$0xff] }
   0xa   :  { %601 = vmatprep.subr.bf16.mxu0 %v600_v10  ;;  %605 = vmatprep.subr.bf16.mxu1 %v604_v36  ;;  %v620_v47 = vpack.c.bf16 %v274_v46, %v273_v45  ;;  %v624_v50 = vpack.c.bf16 %v276_v49, %v275_v48  ;;  %v277_v59 = vld [vmem:[%s869_s3 + $0x60] sm:$0xff]  ;;  %v278_v60 = vld [vmem:[%s869_s3 + $0x68] sm:$0xff]  ;;  %v279_v62 = vld [vmem:[%s869_s3 + $0x70] sm:$0xff]  ;;  %p651_p3 = por %p650_p2, %p649_p1 }
   0xb   :  { %607 = vmatpush3.bf16.msra.mxu1 %v604_v36  ;;  %v628_v61 = vpack.c.bf16 %v278_v60, %v277_v59  ;;  %v280_v63 = vld [vmem:[%s869_s3 + $0x78] sm:$0xff]  ;;  %v369_v1 = vld [vmem:[%s872_s6] sm:$0xff]  ;;  %v370_v2 = vld [vmem:[%s872_s6 + $0x8] sm:$0xff] }
   0xc   :  { %541 = vmatmul.mubr.msk.f32.vlgmr.msra.gmra.mrb[0].mxu0 %vm46_vm0, %v34_v7  ;;  %609 = vmatprep.subr.bf16.mxu1 %v608_v38  ;;  %v632_v0 = vpack.c.bf16 %v280_v63, %v279_v62  ;;  %v636_v3 = vpack.c.bf16 %v370_v2, %v369_v1  ;;  %p652_p4 = pnand %p651_p3, %p645_p0 }
   0xd   :  { %603 = vmatpush3.bf16.msra.mxu0 %v600_v10 }
   0xe   :  { %637 = vmatprep.subr.bf16.mxu0 %v636_v3 }
   0xf   :  { %611 = vmatpush3.bf16.msra.mxu1 %v608_v38 }
  0x10   :  { %613 = vmatprep.subr.bf16.mxu1 %v612_v41 }
  0x13   :  { %615 = vmatpush3.bf16.msra.mxu1 %v612_v41 }
  0x14   :  { %617 = vmatprep.subr.bf16.mxu1 %v616_v44 }
  0x17   :  { %619 = vmatpush3.bf16.msra.mxu1 %v616_v44 }
  0x18   :  { %621 = vmatprep.subr.bf16.mxu1 %v620_v47 }
  0x1b   :  { %623 = vmatpush3.bf16.msra.mxu1 %v620_v47 }
  0x1c   :  { %625 = vmatprep.subr.bf16.mxu1 %v624_v50 }
  0x1f   :  { %627 = vmatpush3.bf16.msra.mxu1 %v624_v50 }
  0x20   :  { %629 = vmatprep.subr.bf16.mxu1 %v628_v61 }
  0x23   :  { %631 = vmatpush3.bf16.msra.mxu1 %v628_v61 }
  0x24   :  { %633 = vmatprep.subr.bf16.mxu1 %v632_v0 }
  0x27   :  { %635 = vmatpush3.bf16.msra.mxu1 %v632_v0 }
  0xdf   :  { %v542_v12 = vpop.f32.mrb[0].mxu0 }
  0xe0   :  { %v756_v13 = vadd.f32 %v542_v12, %v487_v11  ;;  %v119_v14 = vpop.f32.mrb[1].mxu0 }
  0xe1   :  { %v758_v15 = vadd.f32 %v487_v11, %v119_v14  ;;  %v668_v14 = vmov 1.0  }
  0xe2   :  { %v129_v17 = vmul.f32 -2.0, %v756_v13 }
  0xe3   :  { %v128_v16 = vmul.f32 -2.0, %v758_v15 }
  0xe5   :  { %547 = vmatprep.mubr.msk.f32.mxu0 %vm139_vm1, %v128_v16 }
  0xe6   :  { %548 = vmatmul.mubr.msk.f32.vlgmr.msra.gmra.mrb[2].mxu0 %vm139_vm1, %v129_v17 }
  0xe7   :  { %639 = vmatpush3.bf16.msra.mxu0 %v636_v3 }
 0x1b9   :  { %v549_v19 = vpop.f32.mrb[2].mxu0 }
 0x1ba   :  { %v212_v20 = vpop.f32.mrb[3].mxu0  ;;  %v218_v22 = vadd.f32 %v549_v19, %v490_v18 }
 0x1bb   :  { %v213_v21 = vadd.f32 %v490_v18, %v212_v20 }
 0x1bd   :  { %223 = vmin.xlane.f32.xlu0 %v213_v21 }
 0x1c1   :  { %225 = vmin.xlane.f32.xlu0 %v218_v22 }
 0x24a   :  { %v224_v25 = vpop.xlane.xlu0 %223 }
 0x24b   :  { %vm227_vm2 = vcmp.le.f32.partialorder %v213_v21, %v224_v25 }
 0x24c   :  { %v229_v26 = vsel %vm227_vm2, %v767_v24, 128 }
 0x24d   :  { %v232_v27 = vshra.s32 %v229_v26, 16  ;;  %v231_v51 = vand.u32 65535, %v229_v26 }
 0x24e   :  { %v226_v28 = vpop.xlane.xlu0 %225 }
 0x24f   :  { %vm228_vm3 = vcmp.le.f32.partialorder %v218_v22, %v226_v28  ;;  %v234_v29 = vcvt.s32.f32 %v232_v27  ;;  %v233_v54 = vcvt.s32.f32 %v231_v51 }
 0x250   :  { %v230_v30 = vsel %vm228_vm3, %v767_v24, 128 }
 0x251   :  { %235 = vmin.xlane.f32.xlu1 %v234_v29  ;;  %v246_v31 = vshra.s32 %v230_v30, 16  ;;  %v245_v52 = vand.u32 65535, %v230_v30 }
 0x253   :  { %v248_v32 = vcvt.s32.f32 %v246_v31  ;;  %v247_v57 = vcvt.s32.f32 %v245_v52 }
 0x255   :  { %249 = vmin.xlane.f32.xlu1 %v248_v32 }
 0x2de   :  { %v236_v53 = vpop.xlane.xlu1 %235 }
 0x2df   :  { %vm237_vm4 = vcmp.eq.f32.partialorder %v234_v29, %v236_v53  ;;  %v242_v4 = vcvt.f32.s32 %v236_v53 }
 0x2e0   :  { %v238_v55 = vsel %vm237_vm4, %v233_v54, inf }
 0x2e1   :  { %239 = vmin.xlane.f32.xlu0 %v238_v55  ;;  %v243_v6 = vshll.u32 %v242_v4, 16 }
 0x2e2   :  { %v250_v56 = vpop.xlane.xlu1 %249 }
 0x2e3   :  { %vm251_vm5 = vcmp.eq.f32.partialorder %v248_v32, %v250_v56  ;;  %v256_v7 = vcvt.f32.s32 %v250_v56 }
 0x2e4   :  { %v252_v58 = vsel %vm251_vm5, %v247_v57, inf }
 0x2e5   :  { %253 = vmin.xlane.f32.xlu1 %v252_v58  ;;  %v257_v11 = vshll.u32 %v256_v7, 16 }
 0x36e   :  { %v240_v5 = vpop.xlane.xlu0 %239 }
 0x36f   :  { %v241_v8 = vcvt.f32.s32 %v240_v5 }
 0x371   :  { %v244_v9 = vadd.s32 %v243_v6, %v241_v8 }
 0x372   :  { %v254_v10 = vpop.xlane.xlu1 %253 }
 0x373   :  { %v255_v12 = vcvt.f32.s32 %v254_v10  ;;  %vm259_vm7 = vcmp.eq.s32.totalorder %v767_v24, %v244_v9  ;;  %461 = vst.msk [vmem:[%s875_s9] sm:$0xff] %vm366_vm6, %v244_v9 }
 0x374   :  { %582 = vmatprep.mubr.msk.f32.mxu1 %vm259_vm7, %v668_v14 }
 0x375   :  { %v258_v16 = vadd.s32 %v257_v11, %v255_v12 }
 0x377   :  { %462 = vst.msk [vmem:[%s875_s9 + $0x8] sm:$0xff] %vm366_vm6, %v258_v16  ;;  %vm260_vm8 = vcmp.eq.s32.totalorder %v767_v24, %v258_v16 }
 0x378   :  { %583 = vmatmul.mubr.msk.f32.vlgmr.msra.gmra.mrb[0].mxu1 %vm260_vm8, %v668_v14 }
 0x44b   :  { %v584_v17 = vpop.f32.mrb[0].mxu1 }
 0x44c   :  { %v357_v18 = vsub.f32 %v584_v17, %v756_v13  ;;  %v347_v19 = vpop.f32.mrb[1].mxu1 }
 0x44d   :  { %v356_v20 = vsub.f32 %v347_v19, %v758_v15  ;;  %589 = vmatprep.mubr.msk.f32.mxu0 %vm139_vm1, %v347_v19  ;;  %v497_v15 = vld [vmem:[%s873_s7] ss:$0 sm:$0xff] }
 0x44e   :  { %v359_v21 = vmul.f32 %v357_v18, %v357_v18  ;;  %590 = vmatmul.mubr.msk.f32.vlgmr.msra.gmra.mrb[4].mxu0 %vm139_vm1, %v584_v17 }
 0x44f   :  { %v358_v22 = vmul.f32 %v356_v20, %v356_v20 }
 0x450   :  { %v363_v23 = vsel %vm139_vm1, %v359_v21, 0.0 }
 0x451   :  { %364 = vadd.xlane.f32.xlu1 %v363_v23  ;;  %v360_v25 = vsel %vm139_vm1, %v358_v22, 0.0 }
 0x452   :  { %361 = vadd.xlane.f32.xlu0 %v360_v25 }
 0x4de   :  { %v365_v24 = vpop.xlane.xlu1 %364 }
 0x4df   :  { %368 = vst.msk [vmem:[%s876_s10 + $0x8] sm:$0xff] %vm366_vm6, %v365_v24  ;;  %v362_v13 = vpop.xlane.xlu0 %361 }
 0x4e0   :  { %367 = vst.msk [vmem:[%s876_s10] sm:$0xff] %vm366_vm6, %v362_v13 }
 0x521   :  { %v591_v26 = vpop.f32.mrb[4].mxu0 }
 0x522   :  { %v456_v27 = vadd.f32 %v591_v26, %v497_v15  ;;  %v450_v28 = vpop.f32.mrb[5].mxu0 }
 0x523   :  { %v451_v29 = vadd.f32 %v497_v15, %v450_v28 }
 0x524   :  { %460 = vst.msk [vmem:[#allocation2 + $0x8] sm:$0xff] %vm46_vm0, %v456_v27 }
 0x525   :  { %459 = vst.msk [vmem:[#allocation2] sm:$0xff] %vm46_vm0, %v451_v29 }
 0x526   :  { %655 = shalt.err (!%p652_p4)
}
 0x527   :  { %s656_s28 = scalar_lea.hbm %s874_s8, 256 }
 0x528   :  { %p657_p5 = scmp.ne.s32.totalorder %s874_s8, %s656_s28  ;;  %p660_p6 = scmp.lt.u32.totalorder %s656_s28, %s874_s8 }
 0x52a   :  { %p662_p7 = pnand %p660_p6, %p657_p5 }
 0x52c   :  { %665 = shalt.err (!%p662_p7)
}
 0x52d   :  { %s670_s5 = smov 128   ;;  %s671_s30 = smov 8  }
 0x52e   :  { %474 = dma.vmem_to_hbm [thread:$0]  %s469_s26, 256, %s874_s8, [#allocation3], %s670_s5, %s670_s5, %s671_s30  }
 0x52f   :  { %666 = dma.done.wait [#allocation3], 256  }
 0x530   :  { %667 = vsyncadd [#allocation3], 4294967040 }
 0x531   :  { %486 = vsyncpa [#allocation3], 1 }

// kernel: _lambda_.3
= control target key start
LH: loop header
LB: loop body
LE: loop exit
PB: predicated region body
PF: predicated region fallthrough
CT: control target
= control target key end

     0   :  { %vm46_vm0 = vcmask 261120   ;;  %s1001_s0 = inlined_call_operand.vmem [shape: f32[16,32], index: 0, kind: input, shape index: {}]   ;;  %s1002_s1 = inlined_call_operand.vmem [shape: f32[32,32], index: 1, kind: input, shape index: {}]   ;;  %s1003_s2 = inlined_call_operand.vmem [shape: f32[1,32], index: 2, kind: input, shape index: {}]   ;;  %s1004_s3 = inlined_call_operand.vmem [shape: f32[256,32], index: 3, kind: input, shape index: {}]   ;;  %s1005_s4 = inlined_call_operand.vmem [shape: f32[32,256], index: 4, kind: input, shape index: {}]   ;;  %s1006_s5 = inlined_call_operand.vmem [shape: f32[1,256], index: 5, kind: input, shape index: {}]   ;;  %s1007_s6 = inlined_call_operand.vmem [shape: f32[32,32], index: 6, kind: input, shape index: {}]   ;;  %s1008_s7 = inlined_call_operand.vmem [shape: f32[1,32], index: 7, kind: input, shape index: {}]   ;;  %s1009_s8 = inlined_call_operand.hbm [shape: f32[16,32], index: 8, kind: output, shape index: {0}]   ;;  %s1010_s9 = inlined_call_operand.vmem [shape: s32[16,1], index: 9, kind: output, shape index: {1}]   ;;  %s1011_s10 = inlined_call_operand.vmem [shape: f32[16,1], index: 10, kind: output, shape index: {2}]  }
   0x1   :  { %v35_v0 = vld [vmem:[%s1002_s1] sm:$0xff]  ;;  %v36_v1 = vld [vmem:[%s1002_s1 + $0x8] sm:$0xff]  ;;  %v37_v2 = vld [vmem:[%s1002_s1 + $0x10] sm:$0xff] }
   0x2   :  { %v622_v3 = vpack.c.bf16 %v36_v1, %v35_v0  ;;  %v38_v4 = vld [vmem:[%s1002_s1 + $0x18] sm:$0xff]  ;;  %v33_v5 = vld [vmem:[%s1001_s0] sm:$0xff]  ;;  %v131_v7 = vld [vmem:[%s1005_s4 + $0x8] sm:$0xff] }
   0x3   :  { %v626_v6 = vpack.c.bf16 %v38_v4, %v37_v2  ;;  %608 = vmatprep.mubr.msk.f32.mxu1 %vm46_vm0, %v33_v5  ;;  %v133_v8 = vld [vmem:[%s1005_s4 + $0x18] sm:$0xff] }
   0x4   :  { %623 = vmatprep.subr.bf16.mxu1 %v622_v3 }
   0x5   :  { %16 = vsyncpa [#allocation3], 0  ;;  %625 = vmatpush3.bf16.msra.mxu1 %v622_v3  ;;  %v630_v9 = vpack.c.bf16 %v133_v8, %v131_v7  ;;  %v130_v10 = vld [vmem:[%s1005_s4] sm:$0xff]  ;;  %v132_v11 = vld [vmem:[%s1005_s4 + $0x10] sm:$0xff]  ;;  %v707_v20 = vmov 0.0   ;;  %v140_v28 = vlaneseq  ;;  %vm411_vm9 = vcmask 7168  }
   0x6   :  { %627 = vmatprep.subr.bf16.mxu1 %v626_v6  ;;  %v34_v12 = vld [vmem:[%s1001_s0 + $0x8] sm:$0xff]  ;;  %v632_v13 = vpack.c.bf16 %v132_v11, %v130_v10  ;;  %v137_v15 = vld [vmem:[%s1005_s4 + $0x38] sm:$0xff]  ;;  %v134_v17 = vld [vmem:[%s1005_s4 + $0x20] sm:$0xff]  ;;  %s709_s24 = smov [#allocation2]  }
   0x7   :  { %v135_v14 = vld [vmem:[%s1005_s4 + $0x28] sm:$0xff]  ;;  %v136_v18 = vld [vmem:[%s1005_s4 + $0x30] sm:$0xff]  ;;  %v534_v21 = vld [vmem:[%s1003_s2] ss:$0 sm:$0xff]  ;;  %v141_v29 = vshrl.u32 %v140_v28, 7  ;;  %v825_v45 = vand.u32 127, %v140_v28 }
   0x8   :  { %v634_v16 = vpack.c.bf16 %v137_v15, %v135_v14  ;;  %v636_v19 = vpack.c.bf16 %v136_v18, %v134_v17  ;;  %v138_v31 = vld [vmem:[%s1006_s5] sm:$0x3]  ;;  %v311_v60 = vld [vmem:[%s1004_s3 + $0x88] sm:$0xff]  ;;  %v312_v0 = vld [vmem:[%s1004_s3 + $0x90] sm:$0xff]  ;;  %s515_s25 = sshll.u32 %s709_s24, 4  ;;  %s516_s25 = int_to_ptr.vmem [resolvable:$true] %s515_s25 }
   0x9   :  { %629 = vmatpush3.bf16.msra.mxu1 %v626_v6  ;;  %v142_v30 = vsub.s32 0, %v141_v29  ;;  %v146_v32 = vsub.s32 1, %v141_v29  ;;  %v828_v46 = vadd.s32 128, %v825_v45  ;;  %v310_v59 = vld [vmem:[%s1004_s3 + $0x80] sm:$0xff]  ;;  %v295_v63 = vld [vmem:[%s1004_s3 + $0x8] sm:$0xff]  ;;  %v313_v1 = vld [vmem:[%s1004_s3 + $0x98] sm:$0xff]  ;;  %p688_p1 = scmp.lt.s32.totalorder %s516_s25, %s516_s25 }
   0xa   :  { %631 = vmatprep.subr.bf16.mxu1 %v630_v9  ;;  %v294_v61 = vld [vmem:[%s1004_s3] sm:$0xff]  ;;  %v638_v62 = vpack.c.bf16 %v311_v60, %v310_v59  ;;  %v642_v3 = vpack.c.bf16 %v313_v1, %v312_v0  ;;  %v296_v4 = vld [vmem:[%s1004_s3 + $0x10] sm:$0xff]  ;;  %v297_v5 = vld [vmem:[%s1004_s3 + $0x18] sm:$0xff]  ;;  %s683_s26 = scalar_lea.vmem %s516_s25, 256 }
   0xb   :  { %v143_v33 = vrot.slane %v138_v31, %v142_v30  ;;  %v147_v34 = vrot.slane %v138_v31, %v146_v32  ;;  %v640_v2 = vpack.c.bf16 %v295_v63, %v294_v61  ;;  %v314_v6 = vld [vmem:[%s1004_s3 + $0xa0] sm:$0xff]  ;;  %v315_v7 = vld [vmem:[%s1004_s3 + $0xa8] sm:$0xff]  ;;  %v644_v8 = vpack.c.bf16 %v297_v5, %v296_v4  ;;  %v301_v17 = vld [vmem:[%s1004_s3 + $0x38] sm:$0xff]  ;;  %p684_p0 = scmp.ne.s32.totalorder %s516_s25, %s683_s26  ;;  %p689_p2 = scmp.lt.s32.totalorder %s683_s26, %s683_s26 }
   0xc   :  { %609 = vmatmul.mubr.msk.f32.vlgmr.msra.gmra.mrb[0].mxu1 %vm46_vm0, %v34_v12  ;;  %639 = vmatprep.subr.bf16.mxu0 %v638_v62  ;;  %v646_v9 = vpack.c.bf16 %v315_v7, %v314_v6  ;;  %v298_v10 = vld [vmem:[%s1004_s3 + $0x20] sm:$0xff]  ;;  %v299_v11 = vld [vmem:[%s1004_s3 + $0x28] sm:$0xff]  ;;  %v316_v12 = vld [vmem:[%s1004_s3 + $0xb0] sm:$0xff] }
   0xd   :  { %633 = vmatpush1.bf16.msra.mxu1 %v632_v13  ;;  %220 = vmatprep.mubr.f32.mxu1 %v707_v20  ;;  %v317_v13 = vld [vmem:[%s1004_s3 + $0xb8] sm:$0xff]  ;;  %v648_v14 = vpack.c.bf16 %v299_v11, %v298_v10  ;;  %v318_v18 = vld [vmem:[%s1004_s3 + $0xc0] sm:$0xff]  ;;  %v304_v30 = vld [vmem:[%s1004_s3 + $0x50] sm:$0xff]  ;;  %p690_p3 = por %p689_p2, %p688_p1 }
   0xe   :  { %635 = vmatprep.subr.bf16.mxu1 %v634_v16  ;;  %641 = vmatpush3.bf16.msra.mxu0 %v640_v2  ;;  %v650_v15 = vpack.c.bf16 %v317_v13, %v316_v12  ;;  %v300_v16 = vld [vmem:[%s1004_s3 + $0x30] sm:$0xff]  ;;  %v305_v31 = vld [vmem:[%s1004_s3 + $0x58] sm:$0xff]  ;;  %v322_v32 = vld [vmem:[%s1004_s3 + $0xe0] sm:$0xff] }
   0xf   :  { %643 = vmatprep.subr.bf16.mxu0 %v642_v3  ;;  %v708_v3 = vmov 1.0   ;;  %v416_v5 = vld [vmem:[%s1007_s6 + $0x10] sm:$0xff]  ;;  %v417_v6 = vld [vmem:[%s1007_s6 + $0x18] sm:$0xff]  ;;  %p691_p4 = pnand %p690_p3, %p684_p0 }
  0x10   :  { %v674_v7 = vpack.c.bf16 %v417_v6, %v416_v5 }
  0x11   :  { %637 = vmatpush1.bf16.msra.mxu1 %v636_v19  ;;  %v319_v19 = vld [vmem:[%s1004_s3 + $0xc8] sm:$0xff] }
  0x12   :  { %645 = vmatpush3.bf16.msra.mxu0 %v644_v8 }
  0x13   :  { %647 = vmatprep.subr.bf16.mxu0 %v646_v9 }
  0x16   :  { %649 = vmatpush3.bf16.msra.mxu0 %v648_v14 }
  0x17   :  { %651 = vmatprep.subr.bf16.mxu0 %v650_v15 }
  0xdf   :  { %v610_v22 = vpop.f32.mrb[0].mxu1 }
  0xe0   :  { %v119_v23 = vpop.f32.mrb[1].mxu1  ;;  %v816_v25 = vadd.f32 %v610_v22, %v534_v21  ;;  %v302_v22 = vld [vmem:[%s1004_s3 + $0x40] sm:$0xff] }
  0xe1   :  { %v814_v24 = vadd.f32 %v534_v21, %v119_v23  ;;  %v654_v21 = vpack.c.bf16 %v319_v19, %v318_v18  ;;  %v303_v23 = vld [vmem:[%s1004_s3 + $0x48] sm:$0xff] }
  0xe2   :  { %v129_v27 = vmul.f32 -2.0, %v816_v25  ;;  %v656_v28 = vpack.c.bf16 %v303_v23, %v302_v22 }
  0xe3   :  { %v128_v26 = vmul.f32 -2.0, %v814_v24 }
  0xe5   :  { %537 = vmatmul.mubr.msk.f32.vlgmr.msra.gmra.mrb[2].mxu1 %vm46_vm0, %v128_v26  ;;  %v320_v26 = vld [vmem:[%s1004_s3 + $0xd0] sm:$0xff] }
  0xe6   :  { %226 = vmatprep.mubr.f32.mxu1 %v707_v20  ;;  %v652_v20 = vpack.c.bf16 %v301_v17, %v300_v16 }
  0xe8   :  { %653 = vmatpush3.bf16.msra.mxu0 %v652_v20 }
  0xe9   :  { %538 = vmatmul.mubr.msk.f32.gmra.mrb[4].mxu1 %vm46_vm0, %v129_v27  ;;  %v321_v27 = vld [vmem:[%s1004_s3 + $0xd8] sm:$0xff]  ;;  %655 = vmatprep.subr.bf16.mxu0 %v654_v21 }
  0xea   :  { %v658_v29 = vpack.c.bf16 %v321_v27, %v320_v26 }
  0xec   :  { %657 = vmatpush3.bf16.msra.mxu0 %v656_v28 }
  0xed   :  { %659 = vmatprep.subr.bf16.mxu0 %v658_v29 }
 0x1b8   :  { %v222_v35 = vpop.f32.mrb[2].mxu1 }
 0x1b9   :  { %v223_v36 = vadd.f32 %v222_v35, %v143_v33  ;;  %v224_v37 = vpop.f32.mrb[3].mxu1 }
 0x1ba   :  { %v225_v38 = vadd.f32 %v224_v37, %v147_v34  ;;  %v307_v37 = vld [vmem:[%s1004_s3 + $0x68] sm:$0xff] }
 0x1bc   :  { %v228_v39 = vpop.f32.mrb[4].mxu1  ;;  %v236_v40 = vmin.f32 %v223_v36, %v225_v38 }
 0x1bd   :  { %v229_v41 = vadd.f32 %v228_v39, %v143_v33  ;;  %v230_v42 = vpop.f32.mrb[5].mxu1  ;;  %v323_v33 = vld [vmem:[%s1004_s3 + $0xe8] sm:$0xff] }
 0x1be   :  { %v231_v43 = vadd.f32 %v230_v42, %v147_v34  ;;  %237 = vmin.xlane.f32.xlu0 %v236_v40  ;;  %v660_v34 = vpack.c.bf16 %v305_v31, %v304_v30  ;;  %v662_v35 = vpack.c.bf16 %v323_v33, %v322_v32 }
 0x1c0   :  { %v239_v44 = vmin.f32 %v229_v41, %v231_v43  ;;  %661 = vmatpush3.bf16.msra.mxu0 %v660_v34 }
 0x1c1   :  { %663 = vmatprep.subr.bf16.mxu0 %v662_v35 }
 0x1c2   :  { %240 = vmin.xlane.f32.xlu0 %v239_v44 }
 0x24b   :  { %v238_v47 = vpop.xlane.xlu0 %237 }
 0x24c   :  { %vm242_vm1 = vcmp.le.f32.partialorder %v223_v36, %v238_v47  ;;  %vm243_vm2 = vcmp.le.f32.partialorder %v225_v38, %v238_v47  ;;  %v306_v36 = vld [vmem:[%s1004_s3 + $0x60] sm:$0xff] }
 0x24d   :  { %v246_v48 = vsel %vm242_vm1, %v825_v45, 256  ;;  %v247_v49 = vsel %vm243_vm2, %v828_v46, 256  ;;  %v664_v38 = vpack.c.bf16 %v307_v37, %v306_v36 }
 0x24e   :  { %vm250_vm3 = vcmp.lt.s32.totalorder %v246_v48, %v247_v49 }
 0x24f   :  { %v241_v50 = vpop.xlane.xlu0 %240  ;;  %v832_v51 = vsel %vm250_vm3, %v246_v48, %v247_v49  ;;  %665 = vmatpush3.bf16.msra.mxu0 %v664_v38  ;;  %v324_v49 = vld [vmem:[%s1004_s3 + $0xf0] sm:$0xff] }
 0x250   :  { %vm244_vm4 = vcmp.le.f32.partialorder %v229_v41, %v241_v50  ;;  %vm245_vm5 = vcmp.le.f32.partialorder %v231_v43, %v241_v50  ;;  %v253_v52 = vshra.s32 %v832_v51, 16  ;;  %v252_v39 = vand.u32 65535, %v832_v51  ;;  %v325_v50 = vld [vmem:[%s1004_s3 + $0xf8] sm:$0xff] }
 0x251   :  { %v248_v53 = vsel %vm244_vm4, %v825_v45, 256  ;;  %v249_v54 = vsel %vm245_vm5, %v828_v46, 256  ;;  %v666_v51 = vpack.c.bf16 %v325_v50, %v324_v49 }
 0x252   :  { %vm266_vm6 = vcmp.lt.s32.totalorder %v248_v53, %v249_v54  ;;  %v837_v55 = vcvt.s32.f32 %v253_v52  ;;  %v254_v41 = vcvt.s32.f32 %v252_v39  ;;  %v308_v52 = vld [vmem:[%s1004_s3 + $0x70] sm:$0xff] }
 0x253   :  { %v839_v56 = vsel %vm266_vm6, %v248_v53, %v249_v54  ;;  %v309_v53 = vld [vmem:[%s1004_s3 + $0x78] sm:$0xff]  ;;  %667 = vmatprep.subr.bf16.mxu0 %v666_v51 }
 0x254   :  { %256 = vmin.xlane.f32.xlu1 %v837_v55  ;;  %v269_v57 = vshra.s32 %v839_v56, 16  ;;  %v268_v42 = vand.u32 65535, %v839_v56  ;;  %v668_v54 = vpack.c.bf16 %v309_v53, %v308_v52  ;;  %v415_v56 = vld [vmem:[%s1007_s6 + $0x8] sm:$0xff] }
 0x256   :  { %v843_v58 = vcvt.s32.f32 %v269_v57  ;;  %v270_v47 = vcvt.s32.f32 %v268_v42  ;;  %669 = vmatpush3.bf16.msra.mxu0 %v668_v54 }
 0x258   :  { %272 = vmin.xlane.f32.xlu1 %v843_v58 }
 0x2e1   :  { %v257_v40 = vpop.xlane.xlu1 %256 }
 0x2e2   :  { %vm258_vm7 = vcmp.eq.f32.partialorder %v837_v55, %v257_v40  ;;  %v414_v55 = vld [vmem:[%s1007_s6] sm:$0xff] }
 0x2e3   :  { %v259_v43 = vsel %vm258_vm7, %v254_v41, inf  ;;  %v670_v57 = vpack.c.bf16 %v415_v56, %v414_v55 }
 0x2e4   :  { %260 = vmin.xlane.f32.xlu0 %v259_v43 }
 0x2e5   :  { %v273_v44 = vpop.xlane.xlu1 %272  ;;  %671 = vmatprep.subr.bf16.mxu1 %v670_v57 }
 0x2e6   :  { %vm274_vm8 = vcmp.eq.f32.partialorder %v843_v58, %v273_v44  ;;  %673 = vmatpush3.bf16.msra.mxu1 %v670_v57  ;;  %v263_v58 = vcvt.f32.s32 %v257_v40  ;;  %v279_v61 = vcvt.f32.s32 %v273_v44 }
 0x2e7   :  { %v275_v48 = vsel %vm274_vm8, %v270_v47, inf  ;;  %675 = vmatprep.subr.bf16.mxu1 %v674_v7 }
 0x2e8   :  { %276 = vmin.xlane.f32.xlu1 %v275_v48  ;;  %v264_v60 = vshll.u32 %v263_v58, 16  ;;  %v280_v1 = vshll.u32 %v279_v61, 16 }
 0x2ea   :  { %677 = vmatpush3.bf16.msra.mxu1 %v674_v7 }
 0x371   :  { %v261_v59 = vpop.xlane.xlu0 %260 }
 0x372   :  { %v262_v62 = vcvt.f32.s32 %v261_v59 }
 0x374   :  { %v265_v63 = vadd.s32 %v264_v60, %v262_v62 }
 0x375   :  { %v277_v0 = vpop.xlane.xlu1 %276 }
 0x376   :  { %v278_v2 = vcvt.f32.s32 %v277_v0  ;;  %vm283_vm10 = vcmp.eq.s32.totalorder %v828_v46, %v265_v63  ;;  %vm282_vm11 = vcmp.eq.s32.totalorder %v825_v45, %v265_v63  ;;  %508 = vst.msk [vmem:[%s1010_s9] sm:$0xff] %vm411_vm9, %v265_v63 }
 0x377   :  { %543 = vmatprep.mubr.msk.f32.mxu0 %vm283_vm10, %v708_v3 }
 0x378   :  { %v281_v4 = vadd.s32 %v280_v1, %v278_v2  ;;  %544 = vmatmul.mubr.msk.f32.vlgmr.msra.gmra.mrb[0].mxu0 %vm282_vm11, %v708_v3 }
 0x37a   :  { %vm285_vm12 = vcmp.eq.s32.totalorder %v828_v46, %v281_v4  ;;  %vm284_vm13 = vcmp.eq.s32.totalorder %v825_v45, %v281_v4  ;;  %509 = vst.msk [vmem:[%s1010_s9 + $0x8] sm:$0xff] %vm411_vm9, %v281_v4 }
 0x37b   :  { %545 = vmatprep.mubr.msk.f32.mxu0 %vm285_vm12, %v708_v3 }
 0x37c   :  { %546 = vmatmul.mubr.msk.f32.gmra.mrb[2].mxu0 %vm284_vm13, %v708_v3 }
 0x44b   :  { %v588_v46 = vpop.f32.mrb[0].mxu0 }
 0x44c   :  { %v589_v45 = vpop.f32.mrb[1].mxu0 }
 0x44d   :  { %v590_v8 = vadd.f32 %v589_v45, %v588_v46 }
 0x44f   :  { %v401_v9 = vsub.f32 %v590_v8, %v814_v24  ;;  %v591_v10 = vpop.f32.mrb[2].mxu0  ;;  %619 = vmatprep.mubr.msk.f32.mxu1 %vm46_vm0, %v590_v8 }
 0x450   :  { %v592_v11 = vpop.f32.mrb[3].mxu0 }
 0x451   :  { %v593_v12 = vadd.f32 %v592_v11, %v591_v10  ;;  %v403_v13 = vmul.f32 %v401_v9, %v401_v9 }
 0x453   :  { %v402_v14 = vsub.f32 %v593_v12, %v816_v25  ;;  %620 = vmatmul.mubr.msk.f32.vlgmr.msra.gmra.mrb[6].mxu1 %vm46_vm0, %v593_v12  ;;  %v405_v15 = vsel %vm46_vm0, %v403_v13, 0.0  ;;  %v547_v25 = vld [vmem:[%s1008_s7] ss:$0 sm:$0xff] }
 0x454   :  { %406 = vadd.xlane.f32.xlu0 %v405_v15 }
 0x455   :  { %v404_v16 = vmul.f32 %v402_v14, %v402_v14 }
 0x457   :  { %v408_v17 = vsel %vm46_vm0, %v404_v16, 0.0 }
 0x458   :  { %409 = vadd.xlane.f32.xlu1 %v408_v17 }
 0x4e1   :  { %v407_v18 = vpop.xlane.xlu0 %406 }
 0x4e2   :  { %412 = vst.msk [vmem:[%s1011_s10] sm:$0xff] %vm411_vm9, %v407_v18 }
 0x4e5   :  { %v410_v24 = vpop.xlane.xlu1 %409 }
 0x4e6   :  { %413 = vst.msk [vmem:[%s1011_s10 + $0x8] sm:$0xff] %vm411_vm9, %v410_v24 }
 0x526   :  { %v621_v19 = vpop.f32.mrb[6].mxu1 }
 0x527   :  { %v503_v20 = vadd.f32 %v621_v19, %v547_v25  ;;  %v497_v21 = vpop.f32.mrb[7].mxu1 }
 0x528   :  { %v498_v22 = vadd.f32 %v547_v25, %v497_v21 }
 0x529   :  { %507 = vst.msk [vmem:[#allocation2 + $0x8] sm:$0xff] %vm46_vm0, %v503_v20 }
 0x52a   :  { %506 = vst.msk [vmem:[#allocation2] sm:$0xff] %vm46_vm0, %v498_v22 }
 0x52b   :  { %694 = shalt.err (!%p691_p4)
}
 0x52c   :  { %s695_s1 = scalar_lea.hbm %s1009_s8, 256 }
 0x52d   :  { %p696_p5 = scmp.ne.s32.totalorder %s1009_s8, %s695_s1  ;;  %p699_p6 = scmp.lt.u32.totalorder %s695_s1, %s1009_s8 }
 0x52f   :  { %p701_p7 = pnand %p699_p6, %p696_p5 }
 0x531   :  { %704 = shalt.err (!%p701_p7)
}
 0x532   :  { %s710_s11 = smov 128   ;;  %s711_s12 = smov 8  }
 0x533   :  { %521 = dma.vmem_to_hbm [thread:$0]  %s516_s25, 256, %s1009_s8, [#allocation3], %s710_s11, %s710_s11, %s711_s12  }
 0x534   :  { %705 = dma.done.wait [#allocation3], 256  }
 0x535   :  { %706 = vsyncadd [#allocation3], 4294967040 }
 0x536   :  { %533 = vsyncpa [#allocation3], 1 }

</bundles_post_ra>
